<compile_context>
chip_gen: v5e
topology: v5e:2x2
jax: 0.10.0
libtpu: 0.0.40
codegen_flags: <defaults>
</compile_context>

<pallas_src>
import jax
import jax.numpy as jnp
from jax.experimental import pallas as pl
from jax.experimental.pallas import tpu as pltpu

_BN_EPS = 1e-5
_K, _STRIDE, _PAD = 3, 2, 1  # deconv geometry fixed by the module


def _round_up(x, m):
    return (x + m - 1) // m * m


def _pick_row_tile(m, want, min_steps=2):
    """Row tile (multiple of 16) + padded row count; >= min_steps grid steps when possible."""
    m16 = _round_up(m, 16)
    cap = _round_up(-(-m16 // max(min_steps, 1)), 16)
    tm = max(16, min(want, cap))
    return tm, _round_up(m16, tm)


def _pick_col_tile(total, want):
    t = max(128, min(want, total) // 128 * 128)
    while total % t:
        t -= 128
    return t


# ---------------------------------------------------------------------------
# Pallas kernel (used for both fused GEMMs)
# ---------------------------------------------------------------------------
def _matmul_bias_relu_kernel(x_ref, w_ref, b_ref, o_ref):
    """o = relu(x @ W + b), fp32 accumulation, cast to o dtype (bf16)."""
    acc = jnp.dot(x_ref[...], w_ref[...], preferred_element_type=jnp.float32)
    o_ref[...] = jnp.maximum(acc + b_ref[...], 0.0).astype(o_ref.dtype)


def _matmul_bias_relu(x2d, w, b, *, out_dtype=jnp.bfloat16, tm=1024, tn=1024,
                      min_steps=2):
    """x2d:(M,K) bf16, w:(K,Np) bf16, b:(1,Np) f32 -> (M,Np) out_dtype."""
    m, k = x2d.shape
    np_ = w.shape[1]
    tm, mp = _pick_row_tile(m, tm, min_steps)
    tn = _pick_col_tile(np_, tn)
    if mp != m:  # pad rows only when needed (garbage rows sliced off below)
        x2d = jnp.pad(x2d, ((0, mp - m), (0, 0)))

    out = pl.pallas_call(
        _matmul_bias_relu_kernel,
        out_shape=jax.ShapeDtypeStruct((mp, np_), out_dtype),
        grid_spec=pltpu.PrefetchScalarGridSpec(
            num_scalar_prefetch=0,
            grid=(mp // tm, np_ // tn),
            in_specs=[
                pl.BlockSpec((tm, k), lambda i, j: (i, 0)),
                pl.BlockSpec((k, tn), lambda i, j: (0, j)),
                pl.BlockSpec((1, tn), lambda i, j: (0, j)),
            ],
            out_specs=pl.BlockSpec((tm, tn), lambda i, j: (i, j)),
        ),
        compiler_params=pltpu.CompilerParams(
            dimension_semantics=("parallel", "parallel"),
            vmem_limit_bytes=48 * 1024 * 1024,
        ),
    )(x2d, w, b)
    return out[:m]


# ---------------------------------------------------------------------------
# Plain-JAX glue / parameter folding
# ---------------------------------------------------------------------------
def _bn_fold(bnp):
    scale = bnp["gamma"] / jnp.sqrt(bnp["var"] + _BN_EPS)
    return scale, bnp["beta"] - bnp["mean"] * scale


def init_params(key, in_map, out_map):
    mid = in_map // 4
    ks = jax.random.split(key, 8)

    def bn(k, c):
        kg, kb, km, kv = jax.random.split(k, 4)
        return dict(
            gamma=jax.random.uniform(kg, (c,), jnp.float32, 0.5, 1.5),
            beta=jax.random.normal(kb, (c,), jnp.float32) * 0.1,
            mean=jax.random.normal(km, (c,), jnp.float32) * 0.1,
            var=jax.random.uniform(kv, (c,), jnp.float32, 0.5, 1.5),
        )

    return dict(
        # _mconv_1: 1x1 conv (in_map -> mid) + BN + ReLU
        w1=jax.random.normal(ks[0], (in_map, mid), jnp.float32) * 0.1,
        b1=jax.random.normal(ks[1], (mid,), jnp.float32) * 0.1,
        bn1=bn(ks[2], mid),
        # _mdeconv_1: ConvTranspose2d(mid -> mid, k=3, s=2, p=1); wd[kh,kw,cin,cout]
        wd=jax.random.normal(ks[3], (_K, _K, mid, mid), jnp.float32) * 0.1,
        bd=jax.random.normal(ks[4], (mid,), jnp.float32) * 0.1,
        # _mconv_2: 1x1 conv (mid -> out_map) + BN + ReLU
        w2=jax.random.normal(ks[5], (mid, out_map), jnp.float32) * 0.1,
        b2=jax.random.normal(ks[6], (out_map,), jnp.float32) * 0.1,
        bn2=bn(ks[7], out_map),
    )


def decoder_forward(x_nchw, params, output_size, *, tm=1024, tn=1024):
    n, cin, h, w = x_nchw.shape
    mid = params["w1"].shape[1]
    cout = params["w2"].shape[1]
    hout, wout = output_size
    # output_size must correspond to output_padding in [0, stride-1]
    assert 2 * h - 1 <= hout <= 2 * h and 2 * w - 1 <= wout <= 2 * w, output_size

    cin_p = _round_up(cin, 128)
    cm_p = _round_up(mid, 128)
    kb_p = _round_up(4 * mid, 128)    # Kernel B contraction width (packed shifts)
    nb_p = _round_up(4 * cout, 128)   # Kernel B output width (packed phases)

    # ---- fold BN1 (+ conv1 bias) into the conv1 weights/bias ----
    s1, t1 = _bn_fold(params["bn1"])
    w1eff = params["w1"] * s1[None, :]
    b1eff = params["b1"] * s1 + t1
    w1p = jnp.zeros((cin_p, cm_p), jnp.float32).at[:cin, :mid].set(w1eff)
    b1p = jnp.zeros((1, cm_p), jnp.float32).at[0, :mid].set(b1eff)

    # ---- compose deconv taps with conv2 (+BN2, +deconv bias); pack (shift,phase) ----
    s2, t2 = _bn_fold(params["bn2"])
    w2eff = params["w2"] * s2[None, :]                        # (mid, cout)
    bias2 = params["b2"] * s2 + t2 + params["bd"] @ w2eff     # (cout,)
    comb = jnp.einsum("hwio,oc->hwic", params["wd"], w2eff)   # (3,3,mid,cout)
    wbp = jnp.zeros((kb_p, nb_p), jnp.float32)
    for dh in range(2):
        for dw in range(2):
            for ph in range(2):
                for pw in range(2):
                    kh = ph - 2 * dh + 1
                    kw = pw - 2 * dw + 1
                    if 0 <= kh < _K and 0 <= kw < _K:
                        si, pi = dh * 2 + dw, ph * 2 + pw
                        wbp = wbp.at[si * mid:(si + 1) * mid,
                                     pi * cout:(pi + 1) * cout].set(comb[kh, kw])
    bbp = jnp.zeros((1, nb_p), jnp.float32).at[0, :4 * cout].set(jnp.tile(bias2, 4))

    # ---- Kernel A: conv1x1 + BN1 + ReLU ----
    m_pix = n * h * w
    x2d = jnp.transpose(x_nchw.astype(jnp.bfloat16), (0, 2, 3, 1)).reshape(m_pix, cin)
    if cin_p != cin:
        x2d = jnp.pad(x2d, ((0, 0), (0, cin_p - cin)))
    t2d = _matmul_bias_relu(x2d, w1p.astype(jnp.bfloat16), b1p,
                            out_dtype=jnp.bfloat16, tm=tm, tn=tn)

    # ---- shift-gather of the 4 (dh,dw) neighbours (bf16, compact channels) ----
    t = (t2d if mid == cm_p else t2d[:, :mid]).reshape(n, h, w, mid)
    zc = jnp.zeros((n, h, 1, mid), t.dtype)
    zr = jnp.zeros((n, 1, w, mid), t.dtype)
    s01 = jnp.concatenate([t[:, :, 1:, :], zc], axis=2)          # t[m,   n+1]
    s10 = jnp.concatenate([t[:, 1:, :, :], zr], axis=1)          # t[m+1, n  ]
    s11 = jnp.concatenate([s10[:, :, 1:, :], zc], axis=2)        # t[m+1, n+1]
    t4 = jnp.concatenate([t, s01, s10, s11], axis=-1).reshape(m_pix, 4 * mid)
    if kb_p != 4 * mid:
        t4 = jnp.pad(t4, ((0, 0), (0, kb_p - 4 * mid)))

    # ---- Kernel B: deconv (all 4 phases) + conv1x1 + BN2 + ReLU in one GEMM ----
    out2d = _matmul_bias_relu(t4, wbp.astype(jnp.bfloat16), bbp,
                              out_dtype=jnp.bfloat16, tm=tm, tn=tn)

    # ---- un-interleave phases -> NCHW (single bf16 pass, cast fused) ----
    o = out2d if nb_p == 4 * cout else out2d[:, :4 * cout]
    o = o.reshape(n, h, w, 2, 2, cout)           # (b, m, n, ph, pw, c)
    o = jnp.transpose(o, (0, 5, 1, 3, 2, 4))     # (b, c, m, ph, n, pw)
    o = o.reshape(n, cout, 2 * h, 2 * w).astype(jnp.float32)
    return o[:, :, :hout, :wout]


# ---------------------------------------------------------------------------
# Pure-JAX reference (for correctness check)
# ---------------------------------------------------------------------------
def decoder_reference(x_nchw, params, output_size):
    x = jnp.transpose(x_nchw, (0, 2, 3, 1)).astype(jnp.float32)

    def bn(z, p):
        return (z - p["mean"]) / jnp.sqrt(p["var"] + _BN_EPS) * p["gamma"] + p["beta"]

    t = jax.nn.relu(bn(jnp.einsum("nhwc,co->nhwo", x, params["w1"]) + params["b1"],
                       params["bn1"]))
    hin, win = x.shape[1], x.shape[2]
    hout, wout = output_size
    oph = hout - ((hin - 1) * _STRIDE - 2 * _PAD + _K)
    opw = wout - ((win - 1) * _STRIDE - 2 * _PAD + _K)
    d = jax.lax.conv_general_dilated(
        t, jnp.flip(params["wd"], (0, 1)),
        window_strides=(1, 1),
        padding=[(_K - 1 - _PAD, _K - 1 - _PAD + oph),
                 (_K - 1 - _PAD, _K - 1 - _PAD + opw)],
        lhs_dilation=(_STRIDE, _STRIDE),
        dimension_numbers=("NHWC", "HWIO", "NHWC"),
    ) + params["bd"]
    o = jax.nn.relu(bn(jnp.einsum("nhwc,co->nhwo", d, params["w2"]) + params["b2"],
                       params["bn2"]))
    return jnp.transpose(o, (0, 3, 1, 2))


if __name__ == "__main__":
    N, in_map, out_map, H, W = 2, 16, 8, 16, 16
    x = jax.random.normal(jax.random.PRNGKey(0), (N, in_map, H, W), jnp.float32)
    params = init_params(jax.random.PRNGKey(42), in_map, out_map)
    output_size = (2 * H, 2 * W)  # what LinkNet passes (skip-connection spatial size)

    fwd = jax.jit(decoder_forward, static_argnames=("output_size",))
    out = jax.block_until_ready(fwd(x, params, output_size=output_size))

    ref = decoder_reference(x, params, output_size)
    assert out.shape == (N, out_map, 2 * H, 2 * W), out.shape
    max_err = jnp.max(jnp.abs(out - ref))
    assert jnp.allclose(out, ref, atol=3e-2, rtol=3e-2), f"mismatch vs reference ({max_err})"
    print("KERNEL_OK")
</pallas_src>

<mosaic_0001>
module attributes {stable_mosaic.version = 11 : i64} {
  func.func @_matmul_bias_relu_kernel(%arg0: i32, %arg1: i32, %arg2: memref<256x128xbf16, #tpu.memory_space<vmem>>, %arg3: memref<128x128xbf16, #tpu.memory_space<vmem>>, %arg4: memref<1x128xf32, #tpu.memory_space<vmem>>, %arg5: memref<256x128xbf16, #tpu.memory_space<vmem>>) attributes {dimension_semantics = [#tpu.dimension_semantics<parallel>, #tpu.dimension_semantics<parallel>], iteration_bounds = array<i64: 2, 1>, scalar_prefetch = 0 : i64, scratch_operands = 0 : i64, tpu.core_type = #tpu.core_type<tc>, window_params = [{transform_indices = @transform_0, window_bounds = array<i64: 256, 128>}, {transform_indices = @transform_1, window_bounds = array<i64: 128, 128>}, {transform_indices = @transform_2, window_bounds = array<i64: 1, 128>}, {transform_indices = @transform_3, window_bounds = array<i64: 256, 128>}]} {
    %c0 = arith.constant 0 : index
    %c0_0 = arith.constant 0 : index
    %0 = vector.load %arg2[%c0, %c0_0] : memref<256x128xbf16, #tpu.memory_space<vmem>>, vector<256x128xbf16>
    %c0_1 = arith.constant 0 : index
    %c0_2 = arith.constant 0 : index
    %1 = vector.load %arg3[%c0_1, %c0_2] : memref<128x128xbf16, #tpu.memory_space<vmem>>, vector<128x128xbf16>
    %cst = arith.constant dense<0.000000e+00> : vector<256x128xf32>
    %2 = tpu.matmul %0, %1, %cst {dimension_numbers = #tpu.dot_dimension_numbers<[1], [0], [0], [1], [0, 0, 1, 1], [], []>} : vector<256x128xbf16>, vector<128x128xbf16>, vector<256x128xf32> -> vector<256x128xf32>
    %c0_3 = arith.constant 0 : index
    %c0_4 = arith.constant 0 : index
    %3 = vector.load %arg4[%c0_3, %c0_4] : memref<1x128xf32, #tpu.memory_space<vmem>>, vector<1x128xf32>
    %4 = vector.broadcast %3 : vector<1x128xf32> to vector<256x128xf32>
    %5 = arith.addf %2, %4 : vector<256x128xf32>
    %cst_5 = arith.constant 0.000000e+00 : f32
    %6 = vector.broadcast %cst_5 : f32 to vector<256x128xf32>
    %7 = arith.maximumf %5, %6 : vector<256x128xf32>
    %8 = arith.truncf %7 : vector<256x128xf32> to vector<256x128xbf16>
    %c0_6 = arith.constant 0 : index
    %c0_7 = arith.constant 0 : index
    %9 = vector.load %arg5[%c0_6, %c0_7] : memref<256x128xbf16, #tpu.memory_space<vmem>>, vector<256x128xbf16>
    tpu.vector_store %arg5[%c0_6, %c0_7], %8 {strides = array<i32>} : memref<256x128xbf16, #tpu.memory_space<vmem>>, vector<256x128xbf16>,
    return
  }
  func.func @transform_0(%arg0: i32, %arg1: i32) -> (i32, i32) {
    %c0_i32 = arith.constant 0 : i32
    %c0_i32_0 = arith.constant 0 : i32
    return %arg0, %c0_i32 : i32, i32
  }
  func.func @transform_1(%arg0: i32, %arg1: i32) -> (i32, i32) {
    %c0_i32 = arith.constant 0 : i32
    %c0_i32_0 = arith.constant 0 : i32
    return %c0_i32, %arg1 : i32, i32
  }
  func.func @transform_2(%arg0: i32, %arg1: i32) -> (i32, i32) {
    %c0_i32 = arith.constant 0 : i32
    %c0_i32_0 = arith.constant 0 : i32
    return %c0_i32, %arg1 : i32, i32
  }
  func.func @transform_3(%arg0: i32, %arg1: i32) -> (i32, i32) {
    %c0_i32 = arith.constant 0 : i32
    return %arg0, %arg1 : i32, i32
  }
}

</mosaic_0001>

<bundles_post_ra>
// kernel: decoder_forward.2
= control target key start
LH: loop header
LB: loop body
LE: loop exit
PB: predicated region body
PF: predicated region fallthrough
CT: control target
= control target key end

     0   :  { %s1029_s12 = smov 0   ;;  %s1031_s13 = smov 0   ;;  %s1169_s0 = inlined_call_operand.vmem [shape: bf16[512,128], index: 0, kind: input, shape index: {}]   ;;  %s1170_s1 = inlined_call_operand.vmem [shape: bf16[128,128], index: 1, kind: input, shape index: {}]   ;;  %s1171_s2 = inlined_call_operand.vmem [shape: f32[1,128], index: 2, kind: input, shape index: {}]   ;;  %s1172_s3 = inlined_call_operand.vmem [shape: bf16[512,128], index: 3, kind: output, shape index: {}]  }
   0x1   :  { %s1033_s14 = smov 0  }
   0x2 LB: > { %s25_s15 = sadd.s32 1, %s1003_s13  ;;  %p714_p0 = scmp.ge.s32.totalorder %s1007_s14, 1  ;;  %s1007_s14 = sphi %s1033_s14, %s13_s14   ;;  %s1003_s13 = sphi %s1031_s13, %s1174_s13   ;;  %s999_s12 = sphi %s1029_s12, %s1173_s12  }
   0x3   : > { %p27_p1 = scmp.ge.s32.totalorder %s25_s15, 2  ;;  %p169_p2 = scmp.lt.s32.totalorder %s1007_s14, 3 }
   0x5   : > { %s1176_s15 = smov (%p27_p1, %s25_s15), 0  ;;  %p170_p3 = pnand %p714_p0, %p169_p2 }
   0x6   : > { %s715_s24 = sshll.u32 (!%p170_p3), %s999_s12, 5 }
   0x7   : > { %173 = sbr.rel (%p170_p3) target bundleno = 241 (0xf1), region = 32  ;;  %p204_p4 = scmp.lt.s32.totalorder (!%p170_p3), %s715_s24, 63 }
   0xc   : > { %v840_v0 = vld [vmem:[%s1170_s1 + $0x38] sm:$0xff]  ;;  %v839_v1 = vld [vmem:[%s1170_s1 + $0x30] sm:$0xff]  ;;  %v838_v2 = vld [vmem:[%s1170_s1 + $0x28] sm:$0xff]  ;;  %s1178_s24 = smov (!%p204_p4, %s715_s24), 63 }
   0xd   : > { %421 = vmatpush.bf16.msra.mxu0 %v840_v0  ;;  %936 = vmatpush.bf16.msra.mxu1 %v840_v0  ;;  %v837_v3 = vld [vmem:[%s1170_s1 + $0x20] sm:$0xff]  ;;  %v836_v4 = vld [vmem:[%s1170_s1 + $0x18] sm:$0xff]  ;;  %v835_v5 = vld [vmem:[%s1170_s1 + $0x10] sm:$0xff]  ;;  %s716_s4 = sshll.u32 %s1178_s24, 2 }
   0xe   : > { %937 = vmatpush.bf16.msra.mxu2 %v840_v0  ;;  %938 = vmatpush.bf16.msra.mxu3 %v840_v0  ;;  %v834_v6 = vld [vmem:[%s1170_s1 + $0x8] sm:$0xff]  ;;  %v833_v7 = vld [vmem:[%s1170_s1] sm:$0xff]  ;;  %s1082_s9 = scalar_lea.vmem %s1169_s0, %s716_s4  ;;  %s1114_s17 = scalar_lea.vmem %s1172_s3, %s716_s4 }
   0xf   : > { %v817_v8 = vld [vmem:[%s1082_s9] sm:$0xff]  ;;  %v818_v12 = vld [vmem:[%s1082_s9 + $0x8] sm:$0xff]  ;;  %v819_v16 = vld [vmem:[%s1082_s9 + $0x10] sm:$0xff] }
  0x10   : > { %v821_v9 = vld [vmem:[%s1082_s9 + $0x20] sm:$0xff]  ;;  %v822_v13 = vld [vmem:[%s1082_s9 + $0x28] sm:$0xff]  ;;  %v823_v17 = vld [vmem:[%s1082_s9 + $0x30] sm:$0xff] }
  0x11   : > { %422 = vmatpush.bf16.msra.mxu0 %v839_v1  ;;  %939 = vmatpush.bf16.msra.mxu1 %v839_v1  ;;  %v825_v10 = vld [vmem:[%s1082_s9 + $0x40] sm:$0xff]  ;;  %v826_v14 = vld [vmem:[%s1082_s9 + $0x48] sm:$0xff]  ;;  %v827_v18 = vld [vmem:[%s1082_s9 + $0x50] sm:$0xff] }
  0x12   : > { %940 = vmatpush.bf16.msra.mxu2 %v839_v1  ;;  %941 = vmatpush.bf16.msra.mxu3 %v839_v1  ;;  %v829_v11 = vld [vmem:[%s1082_s9 + $0x60] sm:$0xff]  ;;  %v830_v15 = vld [vmem:[%s1082_s9 + $0x68] sm:$0xff]  ;;  %v831_v19 = vld [vmem:[%s1082_s9 + $0x70] sm:$0xff] }
  0x13   : > { %v820_v20 = vld [vmem:[%s1082_s9 + $0x18] sm:$0xff]  ;;  %v1103_v26 = vld [vmem:[%s1171_s2] ss:$0 sm:$0xff] }
  0x14   : > { %v824_v21 = vld [vmem:[%s1082_s9 + $0x38] sm:$0xff] }
  0x15   : > { %423 = vmatpush.bf16.msra.mxu0 %v838_v2  ;;  %942 = vmatpush.bf16.msra.mxu1 %v838_v2  ;;  %v828_v22 = vld [vmem:[%s1082_s9 + $0x58] sm:$0xff] }
  0x16   : > { %943 = vmatpush.bf16.msra.mxu2 %v838_v2  ;;  %944 = vmatpush.bf16.msra.mxu3 %v838_v2  ;;  %v832_v23 = vld [vmem:[%s1082_s9 + $0x78] sm:$0xff] }
  0x19   : > { %424 = vmatpush.bf16.msra.mxu0 %v837_v3  ;;  %945 = vmatpush.bf16.msra.mxu1 %v837_v3 }
  0x1a   : > { %946 = vmatpush.bf16.msra.mxu2 %v837_v3  ;;  %947 = vmatpush.bf16.msra.mxu3 %v837_v3 }
  0x1d   : > { %425 = vmatpush.bf16.msra.mxu0 %v836_v4  ;;  %948 = vmatpush.bf16.msra.mxu1 %v836_v4 }
  0x1e   : > { %949 = vmatpush.bf16.msra.mxu2 %v836_v4  ;;  %950 = vmatpush.bf16.msra.mxu3 %v836_v4 }
  0x21   : > { %426 = vmatpush.bf16.msra.mxu0 %v835_v5  ;;  %951 = vmatpush.bf16.msra.mxu1 %v835_v5 }
  0x22   : > { %952 = vmatpush.bf16.msra.mxu2 %v835_v5  ;;  %953 = vmatpush.bf16.msra.mxu3 %v835_v5 }
  0x25   : > { %427 = vmatpush.bf16.msra.mxu0 %v834_v6  ;;  %954 = vmatpush.bf16.msra.mxu1 %v834_v6 }
  0x26   : > { %955 = vmatpush.bf16.msra.mxu2 %v834_v6  ;;  %956 = vmatpush.bf16.msra.mxu3 %v834_v6 }
  0x29   : > { %428 = vmatpush.bf16.msra.mxu0 %v833_v7  ;;  %957 = vmatpush.bf16.msra.mxu1 %v833_v7 }
  0x2a   : > { %958 = vmatpush.bf16.msra.mxu2 %v833_v7  ;;  %959 = vmatpush.bf16.msra.mxu3 %v833_v7 }
  0x2c   : > { %429 = vmatmul.bf16.vlgmr.msra.gmra.mxu0 %v817_v8  ;;  %449 = vmatmul.bf16.vlgmr.msra.gmra.mxu1 %v821_v9 }
  0x2d   : > { %469 = vmatmul.bf16.vlgmr.msra.gmra.mxu2 %v825_v10  ;;  %489 = vmatmul.bf16.vlgmr.msra.gmra.mxu3 %v829_v11 }
  0x3c   : > { %434 = vmatmul.bf16.gmra.mxu0 %v818_v12  ;;  %454 = vmatmul.bf16.gmra.mxu1 %v822_v13 }
  0x3d   : > { %474 = vmatmul.bf16.gmra.mxu2 %v826_v14  ;;  %494 = vmatmul.bf16.gmra.mxu3 %v830_v15 }
  0x4c   : > { %439 = vmatmul.bf16.gmra.mxu0 %v819_v16  ;;  %459 = vmatmul.bf16.gmra.mxu1 %v823_v17 }
  0x4d   : > { %479 = vmatmul.bf16.gmra.mxu2 %v827_v18  ;;  %499 = vmatmul.bf16.gmra.mxu3 %v831_v19 }
  0x5c   : > { %444 = vmatmul.bf16.gmra.mxu0 %v820_v20  ;;  %464 = vmatmul.bf16.gmra.mxu1 %v824_v21 }
  0x5d   : > { %484 = vmatmul.bf16.gmra.mxu2 %v828_v22  ;;  %504 = vmatmul.bf16.gmra.mxu3 %v832_v23 }
  0xa9   : > { %v430_v24 = vpop.f32.mrf.mxu0  ;;  %v450_v25 = vpop.f32.mrf.mxu1 }
  0xaa   : > { %v431_v27 = vadd.f32 %v1103_v26, %v430_v24  ;;  %v451_v28 = vadd.f32 %v1103_v26, %v450_v25 }
  0xac   : > { %v510_v35 = vmax.f32 %v431_v27, 0.0  ;;  %v518_v36 = vmax.f32 %v451_v28, 0.0 }
  0xb0   : > { %v470_v29 = vpop.f32.mrf.mxu2  ;;  %v490_v30 = vpop.f32.mrf.mxu3 }
  0xb1   : > { %v432_v31 = vpop.f32.mrf.mxu0  ;;  %v452_v32 = vpop.f32.mrf.mxu1  ;;  %v471_v41 = vadd.f32 %v1103_v26, %v470_v29  ;;  %v491_v42 = vadd.f32 %v1103_v26, %v490_v30 }
  0xb2   : > { %v433_v33 = vadd.f32 %v1103_v26, %v432_v31  ;;  %v453_v34 = vadd.f32 %v1103_v26, %v452_v32 }
  0xb3   : > { %v526_v49 = vmax.f32 %v471_v41, 0.0  ;;  %v534_v50 = vmax.f32 %v491_v42, 0.0 }
  0xb4   : > { %v511_v37 = vmax.f32 %v433_v33, 0.0  ;;  %v519_v38 = vmax.f32 %v453_v34, 0.0 }
  0xb6   : > { %v844_v39 = vpack.c.bf16 %v511_v37, %v510_v35  ;;  %v864_v40 = vpack.c.bf16 %v519_v38, %v518_v36 }
  0xb8   : > { %845 = vst [vmem:[%s1114_s17] sm:$0xff] %v844_v39   ;;  %v472_v43 = vpop.f32.mrf.mxu2  ;;  %v492_v44 = vpop.f32.mrf.mxu3 }
  0xb9   : > { %924 = vst [vmem:[%s1114_s17 + $0x20] sm:$0xff] %v864_v40   ;;  %v473_v45 = vadd.f32 %v1103_v26, %v472_v43  ;;  %v493_v46 = vadd.f32 %v1103_v26, %v492_v44  ;;  %v435_v47 = vpop.f32.mrf.mxu0  ;;  %v455_v48 = vpop.f32.mrf.mxu1 }
  0xba   : > { %v436_v55 = vadd.f32 %v1103_v26, %v435_v47  ;;  %v456_v56 = vadd.f32 %v1103_v26, %v455_v48 }
  0xbb   : > { %v527_v51 = vmax.f32 %v473_v45, 0.0  ;;  %v535_v52 = vmax.f32 %v493_v46, 0.0 }
  0xbc   : > { %v512_v63 = vmax.f32 %v436_v55, 0.0  ;;  %v520_v0 = vmax.f32 %v456_v56, 0.0 }
  0xbd   : > { %v884_v53 = vpack.c.bf16 %v527_v51, %v526_v49  ;;  %v904_v54 = vpack.c.bf16 %v535_v52, %v534_v50 }
  0xbf   : > { %928 = vst [vmem:[%s1114_s17 + $0x40] sm:$0xff] %v884_v53  }
  0xc0   : > { %932 = vst [vmem:[%s1114_s17 + $0x60] sm:$0xff] %v904_v54   ;;  %v475_v57 = vpop.f32.mrf.mxu2  ;;  %v495_v58 = vpop.f32.mrf.mxu3 }
  0xc1   : > { %v437_v59 = vpop.f32.mrf.mxu0  ;;  %v457_v60 = vpop.f32.mrf.mxu1  ;;  %v476_v5 = vadd.f32 %v1103_v26, %v475_v57  ;;  %v496_v6 = vadd.f32 %v1103_v26, %v495_v58 }
  0xc2   : > { %v438_v61 = vadd.f32 %v1103_v26, %v437_v59  ;;  %v458_v62 = vadd.f32 %v1103_v26, %v457_v60 }
  0xc3   : > { %v528_v13 = vmax.f32 %v476_v5, 0.0  ;;  %v536_v14 = vmax.f32 %v496_v6, 0.0 }
  0xc4   : > { %v513_v1 = vmax.f32 %v438_v61, 0.0  ;;  %v521_v2 = vmax.f32 %v458_v62, 0.0 }
  0xc6   : > { %v849_v3 = vpack.c.bf16 %v513_v1, %v512_v63  ;;  %v869_v4 = vpack.c.bf16 %v521_v2, %v520_v0 }
  0xc8   : > { %921 = vst [vmem:[%s1114_s17 + $0x8] sm:$0xff] %v849_v3   ;;  %v477_v7 = vpop.f32.mrf.mxu2  ;;  %v497_v8 = vpop.f32.mrf.mxu3 }
  0xc9   : > { %925 = vst [vmem:[%s1114_s17 + $0x28] sm:$0xff] %v869_v4   ;;  %v478_v9 = vadd.f32 %v1103_v26, %v477_v7  ;;  %v498_v10 = vadd.f32 %v1103_v26, %v497_v8  ;;  %v440_v11 = vpop.f32.mrf.mxu0  ;;  %v460_v12 = vpop.f32.mrf.mxu1 }
  0xca   : > { %v441_v19 = vadd.f32 %v1103_v26, %v440_v11  ;;  %v461_v20 = vadd.f32 %v1103_v26, %v460_v12 }
  0xcb   : > { %v529_v15 = vmax.f32 %v478_v9, 0.0  ;;  %v537_v16 = vmax.f32 %v498_v10, 0.0 }
  0xcc   : > { %v514_v28 = vmax.f32 %v441_v19, 0.0  ;;  %v522_v29 = vmax.f32 %v461_v20, 0.0 }
  0xcd   : > { %v889_v17 = vpack.c.bf16 %v529_v15, %v528_v13  ;;  %v909_v18 = vpack.c.bf16 %v537_v16, %v536_v14 }
  0xcf   : > { %929 = vst [vmem:[%s1114_s17 + $0x48] sm:$0xff] %v889_v17  }
  0xd0   : > { %933 = vst [vmem:[%s1114_s17 + $0x68] sm:$0xff] %v909_v18   ;;  %v480_v21 = vpop.f32.mrf.mxu2  ;;  %v500_v22 = vpop.f32.mrf.mxu3 }
  0xd1   : > { %v442_v23 = vpop.f32.mrf.mxu0  ;;  %v462_v24 = vpop.f32.mrf.mxu1  ;;  %v481_v34 = vadd.f32 %v1103_v26, %v480_v21  ;;  %v501_v35 = vadd.f32 %v1103_v26, %v500_v22 }
  0xd2   : > { %v443_v25 = vadd.f32 %v1103_v26, %v442_v23  ;;  %v463_v27 = vadd.f32 %v1103_v26, %v462_v24 }
  0xd3   : > { %v530_v42 = vmax.f32 %v481_v34, 0.0  ;;  %v538_v43 = vmax.f32 %v501_v35, 0.0 }
  0xd4   : > { %v515_v30 = vmax.f32 %v443_v25, 0.0  ;;  %v523_v31 = vmax.f32 %v463_v27, 0.0 }
  0xd6   : > { %v854_v32 = vpack.c.bf16 %v515_v30, %v514_v28  ;;  %v874_v33 = vpack.c.bf16 %v523_v31, %v522_v29 }
  0xd8   : > { %922 = vst [vmem:[%s1114_s17 + $0x10] sm:$0xff] %v854_v32   ;;  %v482_v36 = vpop.f32.mrf.mxu2  ;;  %v502_v37 = vpop.f32.mrf.mxu3 }
  0xd9   : > { %926 = vst [vmem:[%s1114_s17 + $0x30] sm:$0xff] %v874_v33   ;;  %v483_v38 = vadd.f32 %v1103_v26, %v482_v36  ;;  %v503_v39 = vadd.f32 %v1103_v26, %v502_v37  ;;  %v445_v40 = vpop.f32.mrf.mxu0  ;;  %v465_v41 = vpop.f32.mrf.mxu1 }
  0xda   : > { %v446_v48 = vadd.f32 %v1103_v26, %v445_v40  ;;  %v466_v49 = vadd.f32 %v1103_v26, %v465_v41 }
  0xdb   : > { %v531_v44 = vmax.f32 %v483_v38, 0.0  ;;  %v539_v45 = vmax.f32 %v503_v39, 0.0 }
  0xdc   : > { %v516_v56 = vmax.f32 %v446_v48, 0.0  ;;  %v524_v57 = vmax.f32 %v466_v49, 0.0 }
  0xdd   : > { %v894_v46 = vpack.c.bf16 %v531_v44, %v530_v42  ;;  %v914_v47 = vpack.c.bf16 %v539_v45, %v538_v43 }
  0xdf   : > { %930 = vst [vmem:[%s1114_s17 + $0x50] sm:$0xff] %v894_v46  }
  0xe0   : > { %934 = vst [vmem:[%s1114_s17 + $0x70] sm:$0xff] %v914_v47   ;;  %v485_v50 = vpop.f32.mrf.mxu2  ;;  %v505_v51 = vpop.f32.mrf.mxu3 }
  0xe1   : > { %v447_v52 = vpop.f32.mrf.mxu0  ;;  %v467_v53 = vpop.f32.mrf.mxu1  ;;  %v486_v62 = vadd.f32 %v1103_v26, %v485_v50  ;;  %v506_v63 = vadd.f32 %v1103_v26, %v505_v51 }
  0xe2   : > { %v448_v54 = vadd.f32 %v1103_v26, %v447_v52  ;;  %v468_v55 = vadd.f32 %v1103_v26, %v467_v53 }
  0xe3   : > { %v532_v4 = vmax.f32 %v486_v62, 0.0  ;;  %v540_v5 = vmax.f32 %v506_v63, 0.0 }
  0xe4   : > { %v517_v58 = vmax.f32 %v448_v54, 0.0  ;;  %v525_v59 = vmax.f32 %v468_v55, 0.0 }
  0xe6   : > { %v859_v60 = vpack.c.bf16 %v517_v58, %v516_v56  ;;  %v879_v61 = vpack.c.bf16 %v525_v59, %v524_v57 }
  0xe8   : > { %923 = vst [vmem:[%s1114_s17 + $0x18] sm:$0xff] %v859_v60   ;;  %v487_v0 = vpop.f32.mrf.mxu2  ;;  %v507_v1 = vpop.f32.mrf.mxu3 }
  0xe9   : > { %927 = vst [vmem:[%s1114_s17 + $0x38] sm:$0xff] %v879_v61   ;;  %v488_v2 = vadd.f32 %v1103_v26, %v487_v0  ;;  %v508_v3 = vadd.f32 %v1103_v26, %v507_v1 }
  0xeb   : > { %v533_v6 = vmax.f32 %v488_v2, 0.0  ;;  %v541_v7 = vmax.f32 %v508_v3, 0.0 }
  0xed   : > { %v899_v8 = vpack.c.bf16 %v533_v6, %v532_v4  ;;  %v919_v9 = vpack.c.bf16 %v541_v7, %v540_v5 }
  0xef   : > { %931 = vst [vmem:[%s1114_s17 + $0x58] sm:$0xff] %v899_v8  }
  0xf0   : > { %935 = vst [vmem:[%s1114_s17 + $0x78] sm:$0xff] %v919_v9  }
  0xf1 PF: > { %s13_s14 = sadd.s32 1, %s1007_s14   ;;  %s1173_s12 = smov %s1003_s13 }
  0xf2   : > { %p10_p5 = scmp.ge.s32.totalorder %s13_s14, 4   ;;  %s1174_s13 = smov %s1176_s15 }
  0xf4   :  { %12 = sbr.rel (!%p10_p5) target bundleno = 2 (0x2), region = 68 }

</bundles_post_ra>
